<compile_context>
chip_gen: v6e
topology: v6e:2x2x1
jax: 0.10.0
libtpu: 0.0.40
codegen_flags: <defaults>
</compile_context>

<pallas_src>
import functools

import jax
import jax.numpy as jnp
from jax.experimental import pallas as pl
from jax.experimental.pallas import tpu as pltpu

D_MODEL = 256
H1 = D_MODEL // 2          # 128
H2 = D_MODEL // 4          # 64
NUM_TARGETS = 3

MAX_TM = 4096              # rows per grid step for 2-D inputs (4 MiB f32 x-block)
MAX_TS = 512               # max seq rows per chunk for 3-D inputs
ROW_BUDGET = 4096          # tm * ts cap for 3-D inputs (keeps the x-block at ~4 MiB f32)
MIN_SPLIT_N = 256          # once n >= this, force >= 2 row tiles (v7x: 2 TensorCores)
VMEM_LIMIT_BYTES = 48 * 1024 * 1024   # > v5e's 16 MiB scoped default, < v7x's 64 MiB physical

# Set to jnp.bfloat16 to halve the dominant HBM read if ~1e-2 tolerance is acceptable;
# all matmuls accumulate in f32 via preferred_element_type regardless.
X_DTYPE = jnp.float32


def _cdiv(a, b):
    return -(-a // b)


def _round_up(v, m):
    return ((v + m - 1) // m) * m


# ----------------------------------------------------------------------------------
# Kernels
# ----------------------------------------------------------------------------------
def _mlp_heads(x, w1, b1, w2, b2, wl, bl):
    """Two ReLU layers + fused last Linear / heads.
    Returns a (rows, 3) slab = [speed | efficiency | quality]."""
    h = jnp.dot(x, w1, preferred_element_type=jnp.float32) + b1
    h = jnp.maximum(h, 0.0)                                   # ReLU
    # TODO(synk): nn.Dropout(0.1) is identity in eval mode; training-mode dropout not implemented.
    h = jnp.dot(h, w2, preferred_element_type=jnp.float32) + b2
    h = jnp.maximum(h, 0.0)                                   # ReLU

    # Last predictor Linear with the three 3->1 heads folded in (see wrapper): (rows, 3)
    z = jnp.dot(h, wl, preferred_element_type=jnp.float32) + bl

    # col 0 -> speed (ReLU); cols 1,2 -> efficiency / quality (sigmoid).
    col = jax.lax.broadcasted_iota(jnp.int32, z.shape, dimension=1)
    # Mask the speed column to 0 before exp so a very negative speed logit can never
    # generate an inf on the (discarded) lane.  exp runs on the EUP; reciprocal exact.
    zs = jnp.where(col == 0, 0.0, z)
    sig = pl.reciprocal(1.0 + jnp.exp(-zs), approx=False)
    return jnp.where(col == 0, jnp.maximum(z, 0.0), sig)


def _predictor_kernel_2d(x_ref, w1_ref, b1_ref, w2_ref, b2_ref, wl_ref, bl_ref, o_ref):
    o_ref[...] = _mlp_heads(x_ref[...], w1_ref[...], b1_ref[...],
                            w2_ref[...], b2_ref[...], wl_ref[...], bl_ref[...])


def _predictor_kernel_3d(inv_s, x_ref, w1_ref, b1_ref, w2_ref, b2_ref, wl_ref, bl_ref,
                         o_ref, acc_ref):
    """Fused seq-mean + MLP.  Grid = (row tiles, seq chunks); seq axis is last and
    'arbitrary'; acc_ref accumulates the per-row sum over seq chunks."""
    s = pl.program_id(1)

    @pl.when(s == 0)
    def _():
        acc_ref[...] = jnp.zeros_like(acc_ref)

    # Zero-padded seq rows contribute nothing to the sum.
    acc_ref[...] += jnp.sum(x_ref[...].astype(jnp.float32), axis=1)

    @pl.when(s == pl.num_programs(1) - 1)
    def _():
        xm = acc_ref[...] * inv_s          # mean over the true (unpadded) seq length
        o_ref[...] = _mlp_heads(xm, w1_ref[...], b1_ref[...],
                                w2_ref[...], b2_ref[...], wl_ref[...], bl_ref[...])


# ----------------------------------------------------------------------------------
# Parameters
# ----------------------------------------------------------------------------------
def init_params(key):
    """PyTorch-Linear-like init (uniform +/- 1/sqrt(fan_in)), float32.
    Weights stored as (in, out); the 3 head weights are stacked into one (3, 3)."""
    ks = jax.random.split(key, 12)

    def lin(kw, kb, fan_in, fan_out):
        bound = 1.0 / jnp.sqrt(fan_in)
        w = jax.random.uniform(kw, (fan_in, fan_out), jnp.float32, -bound, bound)
        b = jax.random.uniform(kb, (1, fan_out), jnp.float32, -bound, bound)
        return w, b

    w1, b1 = lin(ks[0], ks[1], D_MODEL, H1)
    w2, b2 = lin(ks[2], ks[3], H1, H2)
    w3, b3 = lin(ks[4], ks[5], H2, NUM_TARGETS)
    ws, bs = lin(ks[6], ks[7], NUM_TARGETS, 1)      # speed head
    we, be = lin(ks[8], ks[9], NUM_TARGETS, 1)      # efficiency head
    wq, bq = lin(ks[10], ks[11], NUM_TARGETS, 1)    # quality head
    wh = jnp.concatenate([ws, we, wq], axis=1)      # (3, 3)
    bh = jnp.concatenate([bs, be, bq], axis=1)      # (1, 3)
    return (w1, b1, w2, b2, w3, b3, wh, bh)


def _fold_heads(params):
    """Fold the three (3 -> 1) heads into the last predictor Linear (exact algebra)."""
    w1, b1, w2, b2, w3, b3, wh, bh = params
    wl = w3 @ wh                    # (H2, 3), columns = [speed, efficiency, quality]
    bl = b3 @ wh + bh               # (1, 3)
    return (w1.astype(X_DTYPE), b1.astype(jnp.float32),
            w2.astype(X_DTYPE), b2.astype(jnp.float32),
            wl.astype(X_DTYPE), bl.astype(jnp.float32))


# ----------------------------------------------------------------------------------
# Tiling helpers (static shapes only)
# ----------------------------------------------------------------------------------
def _row_tiling(n, row_cap):
    """Pick (tm, n_pad): tm % 8 == 0, tm <= row_cap, pad waste bounded by ~8 rows per
    tile, and >= 2 tiles once n >= MIN_SPLIT_N (so v7x can shard both TensorCores)."""
    n8 = _round_up(max(n, 1), 8)
    min_tiles = 2 if n8 >= MIN_SPLIT_N else 1
    tiles = max(min_tiles, _cdiv(n8, row_cap))
    tm = min(_round_up(_cdiv(n8, tiles), 8), row_cap)
    return tm, _round_up(n8, tm)


def _seq_tiling(s):
    """Pick (ts, s_pad): ts % 8 == 0, ts <= MAX_TS, small seq pad waste."""
    s8 = _round_up(max(s, 1), 8)
    chunks = _cdiv(s8, MAX_TS)
    ts = _round_up(_cdiv(s8, chunks), 8)
    return ts, _round_up(s8, ts)


# ----------------------------------------------------------------------------------
# Wrappers
# ----------------------------------------------------------------------------------
def _forward_2d(x, w1, b1, w2, b2, wl, bl):
    n = x.shape[0]
    x = x.astype(X_DTYPE)

    tm, n_pad = _row_tiling(n, MAX_TM)
    if n_pad != n:
        x = jnp.pad(x, ((0, n_pad - n), (0, 0)))
    grid = (n_pad // tm,)

    full = lambda shape: pl.BlockSpec(shape, lambda i: (0, 0))
    out = pl.pallas_call(
        _predictor_kernel_2d,
        out_shape=jax.ShapeDtypeStruct((n_pad, NUM_TARGETS), jnp.float32),
        grid_spec=pltpu.PrefetchScalarGridSpec(
            num_scalar_prefetch=0,
            grid=grid,
            in_specs=[
                pl.BlockSpec((tm, D_MODEL), lambda i: (i, 0)),        # x (streamed)
                full((D_MODEL, H1)), full((1, H1)),                   # W1, b1 (resident)
                full((H1, H2)), full((1, H2)),                        # W2, b2 (resident)
                full((H2, NUM_TARGETS)), full((1, NUM_TARGETS)),      # fused W3@Wh, bias
            ],
            out_specs=pl.BlockSpec((tm, NUM_TARGETS), lambda i: (i, 0)),
        ),
        compiler_params=pltpu.CompilerParams(
            dimension_semantics=("parallel",),
            vmem_limit_bytes=VMEM_LIMIT_BYTES),
    )(x, w1, b1, w2, b2, wl, bl)
    return out[:n]


def _forward_3d(x, w1, b1, w2, b2, wl, bl):
    b, s, d = x.shape
    x = x.astype(X_DTYPE)

    ts, s_pad = _seq_tiling(s)
    row_cap = max(8, (ROW_BUDGET // ts) // 8 * 8)
    tm, n_pad = _row_tiling(b, row_cap)
    if (n_pad, s_pad) != (b, s):
        x = jnp.pad(x, ((0, n_pad - b), (0, s_pad - s), (0, 0)))
    grid = (n_pad // tm, s_pad // ts)

    full = lambda shape: pl.BlockSpec(shape, lambda i, j: (0, 0))
    kernel = functools.partial(_predictor_kernel_3d, 1.0 / float(s))
    out = pl.pallas_call(
        kernel,
        out_shape=jax.ShapeDtypeStruct((n_pad, NUM_TARGETS), jnp.float32),
        grid_spec=pltpu.PrefetchScalarGridSpec(
            num_scalar_prefetch=0,
            grid=grid,
            in_specs=[
                pl.BlockSpec((tm, ts, D_MODEL), lambda i, j: (i, j, 0)),  # x chunk
                full((D_MODEL, H1)), full((1, H1)),
                full((H1, H2)), full((1, H2)),
                full((H2, NUM_TARGETS)), full((1, NUM_TARGETS)),
            ],
            out_specs=pl.BlockSpec((tm, NUM_TARGETS), lambda i, j: (i, 0)),
            scratch_shapes=[pltpu.VMEM((tm, D_MODEL), jnp.float32)],
        ),
        compiler_params=pltpu.CompilerParams(
            dimension_semantics=("parallel", "arbitrary"),
            vmem_limit_bytes=VMEM_LIMIT_BYTES),
    )(x, w1, b1, w2, b2, wl, bl)
    return out[:b]


@jax.jit
def price_discovery_predictor(x, params):
    """Pallas-backed forward.  x: (B, D) or (B, S, D).
    Returns (speed, efficiency, quality), each of shape (B, 1)."""
    assert x.shape[-1] == D_MODEL
    w1, b1, w2, b2, wl, bl = _fold_heads(params)

    if x.ndim == 2:
        out = _forward_2d(x, w1, b1, w2, b2, wl, bl)
    elif x.ndim == 3:
        out = _forward_3d(x, w1, b1, w2, b2, wl, bl)
    else:
        raise ValueError(f"expected 2-D or 3-D input, got shape {x.shape}")

    return out[:, 0:1], out[:, 1:2], out[:, 2:3]


# ----------------------------------------------------------------------------------
# Pure-JAX reference (mirrors the PyTorch module, eval mode)
# ----------------------------------------------------------------------------------
def _reference(x, params):
    w1, b1, w2, b2, w3, b3, wh, bh = params
    if x.ndim == 3:
        x = jnp.mean(x, axis=1)
    x = x.astype(jnp.float32)
    h = jax.nn.relu(x @ w1 + b1[0])
    h = jax.nn.relu(h @ w2 + b2[0])
    feats = h @ w3 + b3[0]
    heads = feats @ wh + bh[0]          # three independent 3->1 heads, stacked
    speed = jax.nn.relu(heads[:, 0:1])
    efficiency = jax.nn.sigmoid(heads[:, 1:2])
    quality = jax.nn.sigmoid(heads[:, 2:3])
    return speed, efficiency, quality


if __name__ == "__main__":
    key = jax.random.PRNGKey(0)
    kp, kx3, kx3b, kx2 = jax.random.split(key, 4)
    params = init_params(kp)

    # 256-wide f32 MXU contractions vs the XLA reference differ at ~1e-5 due to
    # accumulation order; keep 1e-4 (loosen to ~1e-2 only if X_DTYPE = bfloat16).
    ATOL = RTOL = 1e-4

    def check(got, ref, shape):
        assert got.shape == shape, f"shape {got.shape} != {shape}"
        err = float(jnp.max(jnp.abs(got - ref)))
        assert jnp.allclose(got, ref, atol=ATOL, rtol=RTOL), f"max abs err = {err}"

    # 3-D path (fused in-kernel seq-mean): (batch, seq, d_model) -> (batch, 1) heads.
    x3 = jax.random.normal(kx3, (4, 8, D_MODEL), jnp.float32)
    s3, e3, q3 = jax.block_until_ready(price_discovery_predictor(x3, params))
    rs3, re3, rq3 = _reference(x3, params)
    for got, ref in ((s3, rs3), (e3, re3), (q3, rq3)):
        check(got, ref, (4, 1))

    # 3-D path with batch and seq NOT multiples of 8 (exercises zero-padding on both axes).
    x3b = jax.random.normal(kx3b, (3, 5, D_MODEL), jnp.float32)
    s3b, e3b, q3b = jax.block_until_ready(price_discovery_predictor(x3b, params))
    rs3b, re3b, rq3b = _reference(x3b, params)
    for got, ref in ((s3b, rs3b), (e3b, re3b), (q3b, rq3b)):
        check(got, ref, (3, 1))

    # 2-D path with a batch that is not a multiple of 8 (exercises row padding).
    x2 = jax.random.normal(kx2, (5, D_MODEL), jnp.float32)
    s2, e2, q2 = jax.block_until_ready(price_discovery_predictor(x2, params))
    rs2, re2, rq2 = _reference(x2, params)
    for got, ref in ((s2, rs2), (e2, re2), (q2, rq2)):
        check(got, ref, (5, 1))

    print("KERNEL_OK")
</pallas_src>

<mosaic_0001>
module attributes {stable_mosaic.version = 11 : i64} {
  func.func @_predictor_kernel_3d(%arg0: i32, %arg1: i32, %arg2: memref<8x8x256xf32, #tpu.memory_space<vmem>>, %arg3: memref<256x128xf32, #tpu.memory_space<vmem>>, %arg4: memref<1x128xf32, #tpu.memory_space<vmem>>, %arg5: memref<128x64xf32, #tpu.memory_space<vmem>>, %arg6: memref<1x64xf32, #tpu.memory_space<vmem>>, %arg7: memref<64x3xf32, #tpu.memory_space<vmem>>, %arg8: memref<1x3xf32, #tpu.memory_space<vmem>>, %arg9: memref<8x3xf32, #tpu.memory_space<vmem>>, %arg10: memref<8x256xf32, #tpu.memory_space<vmem>>) attributes {dimension_semantics = [#tpu.dimension_semantics<parallel>, #tpu.dimension_semantics<arbitrary>], iteration_bounds = array<i64: 1, 1>, scalar_prefetch = 0 : i64, scratch_operands = 1 : i64, tpu.core_type = #tpu.core_type<tc>, window_params = [{transform_indices = @transform_0, window_bounds = array<i64: 8, 8, 256>}, {pipeline_mode = #tpu.pipeline_mode<synchronous>, transform_indices = @transform_1, window_bounds = array<i64: 256, 128>}, {pipeline_mode = #tpu.pipeline_mode<synchronous>, transform_indices = @transform_2, window_bounds = array<i64: 1, 128>}, {pipeline_mode = #tpu.pipeline_mode<synchronous>, transform_indices = @transform_3, window_bounds = array<i64: 128, 64>}, {pipeline_mode = #tpu.pipeline_mode<synchronous>, transform_indices = @transform_4, window_bounds = array<i64: 1, 64>}, {pipeline_mode = #tpu.pipeline_mode<synchronous>, transform_indices = @transform_5, window_bounds = array<i64: 64, 3>}, {pipeline_mode = #tpu.pipeline_mode<synchronous>, transform_indices = @transform_6, window_bounds = array<i64: 1, 3>}, {transform_indices = @transform_7, window_bounds = array<i64: 8, 3>}]} {
    %c0_i32 = arith.constant 0 : i32
    %0 = arith.cmpi eq, %arg1, %c0_i32 : i32
    %1 = arith.extui %0 : i1 to i32
    %c0_i32_0 = arith.constant 0 : i32
    %2 = arith.cmpi ne, %1, %c0_i32_0 : i32
    scf.if %2 {
      %cst_9 = arith.constant 0.000000e+00 : f32
      %11 = vector.broadcast %cst_9 : f32 to vector<8x256xf32>
      %c0_10 = arith.constant 0 : index
      %c0_11 = arith.constant 0 : index
      %12 = vector.load %arg10[%c0_10, %c0_11] : memref<8x256xf32, #tpu.memory_space<vmem>>, vector<8x256xf32>
      tpu.vector_store %arg10[%c0_10, %c0_11], %11 {strides = array<i32>} : memref<8x256xf32, #tpu.memory_space<vmem>>, vector<8x256xf32>,
    } else {
    }
    %c0 = arith.constant 0 : index
    %c0_1 = arith.constant 0 : index
    %3 = vector.load %arg10[%c0, %c0_1] : memref<8x256xf32, #tpu.memory_space<vmem>>, vector<8x256xf32>
    %c0_2 = arith.constant 0 : index
    %c0_3 = arith.constant 0 : index
    %c0_4 = arith.constant 0 : index
    %4 = vector.load %arg2[%c0_2, %c0_3, %c0_4] : memref<8x8x256xf32, #tpu.memory_space<vmem>>, vector<8x8x256xf32>
    %cst = arith.constant dense<0.000000e+00> : vector<8x256xf32>
    %5 = vector.multi_reduction <add>, %4, %cst [1] : vector<8x8x256xf32> to vector<8x256xf32>
    %6 = arith.addf %3, %5 : vector<8x256xf32>
    %c0_5 = arith.constant 0 : index
    %c0_6 = arith.constant 0 : index
    %7 = vector.load %arg10[%c0_5, %c0_6] : memref<8x256xf32, #tpu.memory_space<vmem>>, vector<8x256xf32>
    tpu.vector_store %arg10[%c0_5, %c0_6], %6 {strides = array<i32>} : memref<8x256xf32, #tpu.memory_space<vmem>>, vector<8x256xf32>,
    %c0_i32_7 = arith.constant 0 : i32
    %8 = arith.cmpi eq, %arg1, %c0_i32_7 : i32
    %9 = arith.extui %8 : i1 to i32
    %c0_i32_8 = arith.constant 0 : i32
    %10 = arith.cmpi ne, %9, %c0_i32_8 : i32
    scf.if %10 {
      %c0_9 = arith.constant 0 : index
      %c0_10 = arith.constant 0 : index
      %11 = vector.load %arg10[%c0_9, %c0_10] : memref<8x256xf32, #tpu.memory_space<vmem>>, vector<8x256xf32>
      %cst_11 = arith.constant 1.250000e-01 : f32
      %12 = vector.broadcast %cst_11 : f32 to vector<8x256xf32>
      %13 = arith.mulf %11, %12 : vector<8x256xf32>
      %c0_12 = arith.constant 0 : index
      %c0_13 = arith.constant 0 : index
      %14 = vector.load %arg3[%c0_12, %c0_13] : memref<256x128xf32, #tpu.memory_space<vmem>>, vector<256x128xf32>
      %c0_14 = arith.constant 0 : index
      %c0_15 = arith.constant 0 : index
      %15 = vector.load %arg4[%c0_14, %c0_15] : memref<1x128xf32, #tpu.memory_space<vmem>>, vector<1x128xf32>
      %c0_16 = arith.constant 0 : index
      %c0_17 = arith.constant 0 : index
      %16 = vector.load %arg5[%c0_16, %c0_17] : memref<128x64xf32, #tpu.memory_space<vmem>>, vector<128x64xf32>
      %c0_18 = arith.constant 0 : index
      %c0_19 = arith.constant 0 : index
      %17 = vector.load %arg6[%c0_18, %c0_19] : memref<1x64xf32, #tpu.memory_space<vmem>>, vector<1x64xf32>
      %c0_20 = arith.constant 0 : index
      %c0_21 = arith.constant 0 : index
      %18 = vector.load %arg7[%c0_20, %c0_21] : memref<64x3xf32, #tpu.memory_space<vmem>>, vector<64x3xf32>
      %c0_22 = arith.constant 0 : index
      %c0_23 = arith.constant 0 : index
      %19 = vector.load %arg8[%c0_22, %c0_23] : memref<1x3xf32, #tpu.memory_space<vmem>>, vector<1x3xf32>
      %cst_24 = arith.constant dense<0.000000e+00> : vector<8x128xf32>
      %20 = tpu.matmul %13, %14, %cst_24 {dimension_numbers = #tpu.dot_dimension_numbers<[1], [0], [0], [1], [0, 0, 1, 1], [], []>} : vector<8x256xf32>, vector<256x128xf32>, vector<8x128xf32> -> vector<8x128xf32>
      %21 = vector.broadcast %15 : vector<1x128xf32> to vector<8x128xf32>
      %22 = arith.addf %20, %21 : vector<8x128xf32>
      %cst_25 = arith.constant 0.000000e+00 : f32
      %23 = vector.broadcast %cst_25 : f32 to vector<8x128xf32>
      %24 = arith.maximumf %22, %23 : vector<8x128xf32>
      %cst_26 = arith.constant dense<0.000000e+00> : vector<8x64xf32>
      %25 = tpu.matmul %24, %16, %cst_26 {dimension_numbers = #tpu.dot_dimension_numbers<[1], [0], [0], [1], [0, 0, 1, 1], [], []>} : vector<8x128xf32>, vector<128x64xf32>, vector<8x64xf32> -> vector<8x64xf32>
      %26 = vector.broadcast %17 : vector<1x64xf32> to vector<8x64xf32>
      %27 = arith.addf %25, %26 : vector<8x64xf32>
      %cst_27 = arith.constant 0.000000e+00 : f32
      %28 = vector.broadcast %cst_27 : f32 to vector<8x64xf32>
      %29 = arith.maximumf %27, %28 : vector<8x64xf32>
      %cst_28 = arith.constant dense<0.000000e+00> : vector<8x3xf32>
      %30 = tpu.matmul %29, %18, %cst_28 {dimension_numbers = #tpu.dot_dimension_numbers<[1], [0], [0], [1], [0, 0, 1, 1], [], []>} : vector<8x64xf32>, vector<64x3xf32>, vector<8x3xf32> -> vector<8x3xf32>
      %31 = vector.broadcast %19 : vector<1x3xf32> to vector<8x3xf32>
      %32 = arith.addf %30, %31 : vector<8x3xf32>
      %33 = tpu.iota {dimensions = array<i32: 1>} : vector<8x3xi32>
      %c0_i32_29 = arith.constant 0 : i32
      %34 = vector.broadcast %c0_i32_29 : i32 to vector<8x3xi32>
      %35 = arith.cmpi eq, %33, %34 : vector<8x3xi32>
      %cst_30 = arith.constant 0.000000e+00 : f32
      %36 = vector.broadcast %cst_30 : f32 to vector<8x3xf32>
      %37 = arith.select %35, %36, %32 : vector<8x3xi1>, vector<8x3xf32>
      %cst_31 = arith.constant 0.000000e+00 : f32
      %38 = vector.broadcast %cst_31 : f32 to vector<8x3xf32>
      %39 = arith.subf %38, %37 : vector<8x3xf32>
      %40 = math.exp %39 : vector<8x3xf32>
      %cst_32 = arith.constant 1.000000e+00 : f32
      %41 = vector.broadcast %cst_32 : f32 to vector<8x3xf32>
      %42 = arith.addf %41, %40 : vector<8x3xf32>
      %43 = tpu.reciprocal %42 : vector<8x3xf32> -> vector<8x3xf32>
      %c0_i32_33 = arith.constant 0 : i32
      %44 = vector.broadcast %c0_i32_33 : i32 to vector<8x3xi32>
      %45 = arith.cmpi eq, %33, %44 : vector<8x3xi32>
      %cst_34 = arith.constant 0.000000e+00 : f32
      %46 = vector.broadcast %cst_34 : f32 to vector<8x3xf32>
      %47 = arith.maximumf %32, %46 : vector<8x3xf32>
      %48 = arith.select %45, %47, %43 : vector<8x3xi1>, vector<8x3xf32>
      %c0_35 = arith.constant 0 : index
      %c0_36 = arith.constant 0 : index
      %49 = vector.load %arg9[%c0_35, %c0_36] : memref<8x3xf32, #tpu.memory_space<vmem>>, vector<8x3xf32>
      tpu.vector_store %arg9[%c0_35, %c0_36], %48 {strides = array<i32>} : memref<8x3xf32, #tpu.memory_space<vmem>>, vector<8x3xf32>,
    } else {
    }
    return
  }
  func.func @transform_0(%arg0: i32, %arg1: i32) -> (i32, i32, i32) {
    %c0_i32 = arith.constant 0 : i32
    %c0_i32_0 = arith.constant 0 : i32
    return %arg0, %arg1, %c0_i32 : i32, i32, i32
  }
  func.func @transform_1(%arg0: i32, %arg1: i32) -> (i32, i32) {
    %c0_i32 = arith.constant 0 : i32
    %c0_i32_0 = arith.constant 0 : i32
    %c0_i32_1 = arith.constant 0 : i32
    return %c0_i32, %c0_i32_0 : i32, i32
  }
  func.func @transform_2(%arg0: i32, %arg1: i32) -> (i32, i32) {
    %c0_i32 = arith.constant 0 : i32
    %c0_i32_0 = arith.constant 0 : i32
    %c0_i32_1 = arith.constant 0 : i32
    return %c0_i32, %c0_i32_0 : i32, i32
  }
  func.func @transform_3(%arg0: i32, %arg1: i32) -> (i32, i32) {
    %c0_i32 = arith.constant 0 : i32
    %c0_i32_0 = arith.constant 0 : i32
    %c0_i32_1 = arith.constant 0 : i32
    return %c0_i32, %c0_i32_0 : i32, i32
  }
  func.func @transform_4(%arg0: i32, %arg1: i32) -> (i32, i32) {
    %c0_i32 = arith.constant 0 : i32
    %c0_i32_0 = arith.constant 0 : i32
    %c0_i32_1 = arith.constant 0 : i32
    return %c0_i32, %c0_i32_0 : i32, i32
  }
  func.func @transform_5(%arg0: i32, %arg1: i32) -> (i32, i32) {
    %c0_i32 = arith.constant 0 : i32
    %c0_i32_0 = arith.constant 0 : i32
    %c0_i32_1 = arith.constant 0 : i32
    return %c0_i32, %c0_i32_0 : i32, i32
  }
  func.func @transform_6(%arg0: i32, %arg1: i32) -> (i32, i32) {
    %c0_i32 = arith.constant 0 : i32
    %c0_i32_0 = arith.constant 0 : i32
    %c0_i32_1 = arith.constant 0 : i32
    return %c0_i32, %c0_i32_0 : i32, i32
  }
  func.func @transform_7(%arg0: i32, %arg1: i32) -> (i32, i32) {
    %c0_i32 = arith.constant 0 : i32
    %c0_i32_0 = arith.constant 0 : i32
    return %arg0, %c0_i32 : i32, i32
  }
}

</mosaic_0001>

<bundles_post_ra>
// kernel: price_discovery_predictor.1
= control target key start
LH: loop header
LB: loop body
LE: loop exit
PB: predicated region body
PF: predicated region fallthrough
CT: control target
= control target key end

     0   :  { %v631_v5 = vmov 0.0   ;;  %vm162_vm0 = vcmask 1041409   ;;  %vm164_vm1 = vcmask 1042434   ;;  %vm166_vm2 = vcmask 1043459   ;;  %s941_s1 = inlined_call_operand.vmem [shape: f32[256,128], index: 1, kind: input, shape index: {}]   ;;  %s942_s0 = inlined_call_operand.vmem [shape: f32[8,8,256], index: 0, kind: input, shape index: {}]   ;;  %s943_s3 = inlined_call_operand.vmem [shape: f32[128,64], index: 3, kind: input, shape index: {}]   ;;  %s944_s5 = inlined_call_operand.vmem [shape: f32[64,3], index: 5, kind: input, shape index: {}]   ;;  %s945_s2 = inlined_call_operand.vmem [shape: f32[1,128], index: 2, kind: input, shape index: {}]   ;;  %s946_s4 = inlined_call_operand.vmem [shape: f32[1,64], index: 4, kind: input, shape index: {}]   ;;  %s947_s6 = inlined_call_operand.vmem [shape: f32[1,3], index: 6, kind: input, shape index: {}]   ;;  %s948_s7 = inlined_call_operand.vmem [shape: f32[8,3], index: 7, kind: output, shape index: {}]  }
   0x1   :  { %v227_v0 = vld [vmem:[%s941_s1 + $0xf8] sm:$0xff]  ;;  %v226_v2 = vld [vmem:[%s941_s1 + $0xf0] sm:$0xff]  ;;  %v225_v4 = vld [vmem:[%s941_s1 + $0xe8] sm:$0xff]  ;;  %571 = vmatprep.subr.mxu1 %v631_v5  ;;  %vm168_vm3 = vcmask 1044484   ;;  %vm170_vm4 = vcmask 1045509   ;;  %vm172_vm5 = vcmask 1046534  }
   0x2   :  { %v211_v1 = vld [vmem:[%s941_s1 + $0x78] sm:$0xff]  ;;  %510 = vmatprep.subr.mxu0 %v227_v0  ;;  %v210_v3 = vld [vmem:[%s941_s1 + $0x70] sm:$0xff]  ;;  %v209_v6 = vld [vmem:[%s941_s1 + $0x68] sm:$0xff]  ;;  %vm174_vm6 = vcmask 1047559   ;;  %vm632_vm7 = vmmov 0   ;;  %vm415_vm8 = vcmask 523264  }
   0x3   :  { %511 = vmatpush3.msra.mxu0 %v211_v1  ;;  %v224_v7 = vld [vmem:[%s941_s1 + $0xe0] sm:$0xff]  ;;  %v223_v9 = vld [vmem:[%s941_s1 + $0xd8] sm:$0xff]  ;;  %v222_v11 = vld [vmem:[%s941_s1 + $0xd0] sm:$0xff]  ;;  %603 = vmatprep.mubr.msk.f32.mxu1 %vm632_vm7, %v631_v5  ;;  %vm500_vm10 = vcmask 23552  }
   0x4   :  { %512 = vmatprep.subr.mxu0 %v226_v2  ;;  %v208_v8 = vld [vmem:[%s941_s1 + $0x60] sm:$0xff]  ;;  %v207_v10 = vld [vmem:[%s941_s1 + $0x58] sm:$0xff]  ;;  %v206_v12 = vld [vmem:[%s941_s1 + $0x50] sm:$0xff] }
   0x5   :  { %513 = vmatpush3.msra.mxu0 %v210_v3  ;;  %v221_v13 = vld [vmem:[%s941_s1 + $0xc8] sm:$0xff]  ;;  %v220_v15 = vld [vmem:[%s941_s1 + $0xc0] sm:$0xff]  ;;  %v37_v17 = vld [vmem:[%s942_s0 + $0x18] sm:$0xff] }
   0x6   :  { %514 = vmatprep.subr.mxu0 %v225_v4  ;;  %v205_v14 = vld [vmem:[%s941_s1 + $0x48] sm:$0xff]  ;;  %v41_v19 = vld [vmem:[%s942_s0 + $0x38] sm:$0xff]  ;;  %v68_v24 = vrot.slane %v37_v17, 4  ;;  %v204_v27 = vld [vmem:[%s941_s1 + $0x40] sm:$0xff] }
   0x7   :  { %515 = vmatpush3.msra.mxu0 %v209_v6  ;;  %v35_v16 = vld [vmem:[%s942_s0 + $0x8] sm:$0xff]  ;;  %v45_v22 = vld [vmem:[%s942_s0 + $0x58] sm:$0xff]  ;;  %v92_v26 = vrot.slane %v41_v19, 4  ;;  %v218_v43 = vld [vmem:[%s941_s1 + $0xb0] sm:$0xff] }
   0x8   :  { %516 = vmatprep.subr.mxu0 %v224_v7  ;;  %v39_v18 = vld [vmem:[%s942_s0 + $0x28] sm:$0xff]  ;;  %v56_v20 = vrot.slane %v35_v16, 4  ;;  %v49_v28 = vld [vmem:[%s942_s0 + $0x78] sm:$0xff]  ;;  %v116_v31 = vrot.slane %v45_v22, 4  ;;  %v69_v34 = vadd.f32 %v68_v24, %v37_v17  ;;  %v243_v49 = vld [vmem:[%s943_s3 + $0x70] sm:$0xff] }
   0x9   :  { %517 = vmatpush3.msra.mxu0 %v208_v8  ;;  %v43_v21 = vld [vmem:[%s942_s0 + $0x48] sm:$0xff]  ;;  %v80_v25 = vrot.slane %v39_v18, 4  ;;  %v219_v33 = vld [vmem:[%s941_s1 + $0xb8] sm:$0xff]  ;;  %v93_v36 = vadd.f32 %v92_v26, %v41_v19  ;;  %v140_v37 = vrot.slane %v49_v28, 4  ;;  %v202_v50 = vld [vmem:[%s941_s1 + $0x30] sm:$0xff] }
   0xa   :  { %518 = vmatprep.subr.mxu0 %v223_v9  ;;  %v47_v23 = vld [vmem:[%s942_s0 + $0x68] sm:$0xff]  ;;  %v57_v29 = vadd.f32 %v56_v20, %v35_v16  ;;  %v104_v30 = vrot.slane %v43_v21, 4  ;;  %v203_v38 = vld [vmem:[%s941_s1 + $0x38] sm:$0xff]  ;;  %v117_v41 = vadd.f32 %v116_v31, %v45_v22  ;;  %v70_v44 = vrot.slane %v69_v34, 2  ;;  %v216_v62 = vld [vmem:[%s941_s1 + $0xa0] sm:$0xff] }
   0xb   :  { %519 = vmatpush3.msra.mxu0 %v207_v10  ;;  %v128_v32 = vrot.slane %v47_v23, 4  ;;  %v81_v35 = vadd.f32 %v80_v25, %v39_v18  ;;  %v94_v46 = vrot.slane %v93_v36, 2  ;;  %v141_v47 = vadd.f32 %v140_v37, %v49_v28  ;;  %v244_v48 = vld [vmem:[%s943_s3 + $0x78] sm:$0xff]  ;;  %v217_v55 = vld [vmem:[%s941_s1 + $0xa8] sm:$0xff]  ;;  %v200_v3 = vld [vmem:[%s941_s1 + $0x20] sm:$0xff] }
   0xc   :  { %520 = vmatprep.subr.mxu0 %v222_v11  ;;  %v58_v39 = vrot.slane %v57_v29, 2  ;;  %v105_v40 = vadd.f32 %v104_v30, %v43_v21  ;;  %v118_v53 = vrot.slane %v117_v41, 2  ;;  %572 = vmatpush3.msra.mxu1 %v244_v48  ;;  %v71_v56 = vadd.f32 %v70_v44, %v69_v34  ;;  %v242_v60 = vld [vmem:[%s943_s3 + $0x68] sm:$0xff]  ;;  %v34_v9 = vld [vmem:[%s942_s0] sm:$0xff]  ;;  %v215_v11 = vld [vmem:[%s941_s1 + $0x98] sm:$0xff] }
   0xd   :  { %521 = vmatpush3.msra.mxu0 %v206_v12  ;;  %v129_v42 = vadd.f32 %v128_v32, %v47_v23  ;;  %v82_v45 = vrot.slane %v81_v35, 2  ;;  %v95_v58 = vadd.f32 %v94_v46, %v93_v36  ;;  %v142_v59 = vrot.slane %v141_v47, 2  ;;  %573 = vmatprep.subr.mxu1 %v631_v5  ;;  %v201_v61 = vld [vmem:[%s941_s1 + $0x28] sm:$0xff]  ;;  %v241_v10 = vld [vmem:[%s943_s3 + $0x60] sm:$0xff]  ;;  %v36_v16 = vld [vmem:[%s942_s0 + $0x10] sm:$0xff] }
   0xe   :  { %522 = vmatprep.subr.mxu0 %v221_v13  ;;  %v59_v51 = vadd.f32 %v58_v39, %v57_v29  ;;  %v106_v52 = vrot.slane %v105_v40, 2  ;;  %v119_v1 = vadd.f32 %v118_v53, %v117_v41  ;;  %574 = vmatpush3.msra.mxu1 %v243_v49  ;;  %v72_v4 = vrot.slane %v71_v56, 1  ;;  %v38_v17 = vld [vmem:[%s942_s0 + $0x20] sm:$0xff]  ;;  %v40_v22 = vld [vmem:[%s942_s0 + $0x30] sm:$0xff]  ;;  %v240_v24 = vld [vmem:[%s943_s3 + $0x58] sm:$0xff] }
   0xf   :  { %523 = vmatpush3.msra.mxu0 %v205_v14  ;;  %v130_v54 = vrot.slane %v129_v42, 2  ;;  %v83_v57 = vadd.f32 %v82_v45, %v81_v35  ;;  %v96_v7 = vrot.slane %v95_v58, 1  ;;  %v143_v8 = vadd.f32 %v142_v59, %v141_v47  ;;  %575 = vmatprep.subr.mxu1 %v631_v5  ;;  %v42_v23 = vld [vmem:[%s942_s0 + $0x40] sm:$0xff]  ;;  %v199_v25 = vld [vmem:[%s941_s1 + $0x18] sm:$0xff]  ;;  %v44_v29 = vld [vmem:[%s942_s0 + $0x50] sm:$0xff] }
  0x10   :  { %524 = vmatprep.subr.mxu0 %v220_v15  ;;  %v60_v63 = vrot.slane %v59_v51, 1  ;;  %v107_v0 = vadd.f32 %v106_v52, %v105_v40  ;;  %v120_v14 = vrot.slane %v119_v1, 1  ;;  %576 = vmatpush3.msra.mxu1 %v242_v60  ;;  %v73_v18 = vadd.f32 %v72_v4, %v71_v56  ;;  %v214_v31 = vld [vmem:[%s941_s1 + $0x90] sm:$0xff]  ;;  %v238_v47 = vld [vmem:[%s943_s3 + $0x48] sm:$0xff]  ;;  %v212_v53 = vld [vmem:[%s941_s1 + $0x80] sm:$0xff] }
  0x11   :  { %525 = vmatpush3.msra.mxu0 %v204_v27  ;;  %v131_v2 = vadd.f32 %v130_v54, %v129_v42  ;;  %v84_v6 = vrot.slane %v83_v57, 1  ;;  %v97_v20 = vadd.f32 %v96_v7, %v95_v58  ;;  %v144_v21 = vrot.slane %v143_v8, 1  ;;  %577 = vmatprep.subr.mxu1 %v631_v5  ;;  %v239_v36 = vld [vmem:[%s943_s3 + $0x50] sm:$0xff]  ;;  %v213_v42 = vld [vmem:[%s941_s1 + $0x88] sm:$0xff]  ;;  %v237_v58 = vld [vmem:[%s943_s3 + $0x40] sm:$0xff] }
  0x12   :  { %526 = vmatprep.subr.mxu0 %v219_v33  ;;  %v61_v12 = vadd.f32 %v60_v63, %v59_v51  ;;  %v108_v13 = vrot.slane %v107_v0, 1  ;;  %v121_v27 = vadd.f32 %v120_v14, %v119_v1  ;;  %v50_v30 = vrot.slane %v34_v9, 4  ;;  %578 = vmatpush3.msra.mxu1 %v241_v10  ;;  %v198_v37 = vld [vmem:[%s941_s1 + $0x10] sm:$0xff]  ;;  %v197_v48 = vld [vmem:[%s941_s1 + $0x8] sm:$0xff]  ;;  %v196_v59 = vld [vmem:[%s941_s1] sm:$0xff] }
  0x13   :  { %527 = vmatpush3.msra.mxu0 %v203_v38  ;;  %v132_v15 = vrot.slane %v131_v2, 1  ;;  %v85_v19 = vadd.f32 %v84_v6, %v83_v57  ;;  %v145_v32 = vadd.f32 %v144_v21, %v143_v8  ;;  %v62_v34 = vrot.slane %v36_v16, 4  ;;  %579 = vmatprep.subr.mxu1 %v631_v5  ;;  %v236_v7 = vld [vmem:[%s943_s3 + $0x38] sm:$0xff] }
  0x14   :  { %528 = vmatprep.subr.mxu0 %v218_v43  ;;  %v109_v26 = vadd.f32 %v108_v13, %v107_v0  ;;  %v176_v33 = vsel %vm162_vm0, %v73_v18, %v61_v12  ;;  %v74_v35 = vrot.slane %v38_v17, 4  ;;  %v51_v39 = vadd.f32 %v50_v30, %v34_v9  ;;  %580 = vmatpush3.msra.mxu1 %v240_v24 }
  0x15   :  { %529 = vmatpush3.msra.mxu0 %v202_v50  ;;  %v133_v28 = vadd.f32 %v132_v15, %v131_v2  ;;  %v177_v38 = vsel %vm164_vm1, %v85_v19, %v176_v33  ;;  %v86_v40 = vrot.slane %v40_v22, 4  ;;  %v98_v41 = vrot.slane %v42_v23, 4  ;;  %581 = vmatprep.subr.mxu1 %v631_v5  ;;  %v48_v2 = vld [vmem:[%s942_s0 + $0x70] sm:$0xff] }
  0x16   :  { %530 = vmatprep.subr.mxu0 %v217_v55  ;;  %v178_v43 = vsel %vm166_vm2, %v97_v20, %v177_v38  ;;  %v63_v44 = vadd.f32 %v62_v34, %v36_v16  ;;  %v75_v45 = vadd.f32 %v74_v35, %v38_v17  ;;  %v110_v46 = vrot.slane %v44_v29, 4  ;;  %582 = vmatpush3.msra.mxu1 %v239_v36  ;;  %v235_v16 = vld [vmem:[%s943_s3 + $0x30] sm:$0xff] }
  0x17   :  { %531 = vmatpush3.msra.mxu0 %v201_v61  ;;  %v179_v49 = vsel %vm168_vm3, %v109_v26, %v178_v43  ;;  %v52_v50 = vrot.slane %v51_v39, 2  ;;  %v87_v51 = vadd.f32 %v86_v40, %v40_v22  ;;  %v99_v52 = vadd.f32 %v98_v41, %v42_v23  ;;  %583 = vmatprep.subr.mxu1 %v631_v5  ;;  %v46_v61 = vld [vmem:[%s942_s0 + $0x60] sm:$0xff] }
  0x18   :  { %532 = vmatprep.subr.mxu0 %v216_v62  ;;  %v180_v54 = vsel %vm170_vm4, %v121_v27, %v179_v49  ;;  %v64_v55 = vrot.slane %v63_v44, 2  ;;  %v76_v56 = vrot.slane %v75_v45, 2  ;;  %v111_v57 = vadd.f32 %v110_v46, %v44_v29  ;;  %584 = vmatpush3.msra.mxu1 %v238_v47  ;;  %v233_v46 = vld [vmem:[%s943_s3 + $0x20] sm:$0xff]  ;;  %v232_v47 = vld [vmem:[%s943_s3 + $0x18] sm:$0xff]  ;;  %v230_v49 = vld [vmem:[%s943_s3 + $0x8] sm:$0xff] }
  0x19   :  { %533 = vmatpush3.msra.mxu0 %v200_v3  ;;  %v181_v60 = vsel %vm172_vm5, %v133_v28, %v180_v54  ;;  %v53_v62 = vadd.f32 %v52_v50, %v51_v39  ;;  %v88_v63 = vrot.slane %v87_v51, 2  ;;  %v100_v0 = vrot.slane %v99_v52, 2  ;;  %585 = vmatprep.subr.mxu1 %v631_v5  ;;  %v229_v50 = vld [vmem:[%s943_s3] sm:$0xff] }
  0x1a   :  { %534 = vmatprep.subr.mxu0 %v215_v11  ;;  %v182_v1 = vsel %vm174_vm6, %v145_v32, %v181_v60  ;;  %v65_v3 = vadd.f32 %v64_v55, %v63_v44  ;;  %v77_v4 = vadd.f32 %v76_v56, %v75_v45  ;;  %v112_v6 = vrot.slane %v111_v57, 2  ;;  %586 = vmatpush3.msra.mxu1 %v237_v58  ;;  %v250_v54 = vld [vmem:[%s944_s5 + $0x20] sm:$0xff]  ;;  %v249_v55 = vld [vmem:[%s944_s5 + $0x18] sm:$0xff] }
  0x1b   :  { %535 = vmatpush3.msra.mxu0 %v199_v25  ;;  %v195_v8 = vmul.f32 0.125, %v182_v1  ;;  %v54_v9 = vrot.slane %v53_v62, 1  ;;  %v89_v10 = vadd.f32 %v88_v63, %v87_v51  ;;  %v101_v11 = vadd.f32 %v100_v0, %v99_v52  ;;  %587 = vmatprep.subr.mxu1 %v631_v5  ;;  %v234_v25 = vld [vmem:[%s943_s3 + $0x28] sm:$0xff]  ;;  %v253_v51 = vld [vmem:[%s944_s5 + $0x38] sm:$0xff]  ;;  %v252_v52 = vld [vmem:[%s944_s5 + $0x30] sm:$0xff] }
  0x1c   :  { %536 = vmatprep.subr.mxu0 %v214_v31  ;;  %v66_v12 = vrot.slane %v65_v3, 1  ;;  %v78_v13 = vrot.slane %v77_v4, 1  ;;  %v113_v14 = vadd.f32 %v112_v6, %v111_v57  ;;  %v122_v15 = vrot.slane %v46_v61, 4  ;;  %588 = vmatpush3.msra.mxu1 %v236_v7  ;;  %v506_v57 = vld [vmem:[%s945_s2] ss:$0 sm:$0xff]  ;;  %v247_v63 = vld [vmem:[%s944_s5 + $0x8] sm:$0xff] }
  0x1d   :  { %537 = vmatpush3.msra.mxu0 %v198_v37  ;;  %325 = vmatprep.mubr.f32.mxu0 %v195_v8  ;;  %v55_v17 = vadd.f32 %v54_v9, %v53_v62  ;;  %v90_v18 = vrot.slane %v89_v10, 1  ;;  %v102_v19 = vrot.slane %v101_v11, 1  ;;  %v134_v20 = vrot.slane %v48_v2, 4  ;;  %v248_v62 = vld [vmem:[%s944_s5 + $0x10] sm:$0xff]  ;;  %v246_v0 = vld [vmem:[%s944_s5] sm:$0xff] }
  0x1e   :  { %538 = vmatprep.subr.mxu0 %v213_v42  ;;  %v67_v21 = vadd.f32 %v66_v12, %v65_v3  ;;  %v79_v22 = vadd.f32 %v78_v13, %v77_v4  ;;  %v114_v23 = vrot.slane %v113_v14, 1  ;;  %v123_v24 = vadd.f32 %v122_v15, %v46_v61  ;;  %589 = vmatprep.subr.mxu1 %v631_v5  ;;  %v507_v1 = vld [vmem:[%s946_s4] ss:$0 sm:$0xff] }
  0x1f   :  { %539 = vmatpush3.msra.mxu0 %v197_v48  ;;  %v91_v26 = vadd.f32 %v90_v18, %v89_v10  ;;  %v103_v27 = vadd.f32 %v102_v19, %v101_v11  ;;  %v135_v28 = vadd.f32 %v134_v20, %v48_v2  ;;  %590 = vmatpush3.msra.mxu1 %v235_v16  ;;  %v231_v48 = vld [vmem:[%s943_s3 + $0x10] sm:$0xff]  ;;  %v489_v7 = vlaneseq }
  0x20   :  { %540 = vmatprep.subr.mxu0 %v212_v53  ;;  %v124_v29 = vrot.slane %v123_v24, 2  ;;  %v163_v30 = vsel %vm162_vm0, %v67_v21, %v55_v17  ;;  %591 = vmatprep.subr.mxu1 %v631_v5  ;;  %v115_v31 = vadd.f32 %v114_v23, %v113_v14  ;;  %v251_v53 = vld [vmem:[%s944_s5 + $0x28] sm:$0xff] }
  0x21   :  { %541 = vmatpush3.msra.mxu0 %v196_v59  ;;  %v136_v32 = vrot.slane %v135_v28, 2  ;;  %v165_v33 = vsel %vm164_vm1, %v79_v22, %v163_v30  ;;  %592 = vmatpush3.msra.mxu1 %v234_v25  ;;  %v490_v8 = vand.u32 127, %v489_v7 }
  0x22   :  { %606 = vmatprep.subr.mxu0 %v631_v5  ;;  %v125_v34 = vadd.f32 %v124_v29, %v123_v24  ;;  %v167_v35 = vsel %vm166_vm2, %v91_v26, %v165_v33  ;;  %593 = vmatprep.subr.mxu1 %v631_v5 }
  0x23   :  { %v137_v36 = vadd.f32 %v136_v32, %v135_v28  ;;  %v169_v37 = vsel %vm168_vm3, %v103_v27, %v167_v35  ;;  %594 = vmatpush3.msra.mxu1 %v233_v46  ;;  %vm491_vm9 = vcmp.eq.s32.totalorder %v490_v8, 0 }
  0x24   :  { %v126_v38 = vrot.slane %v125_v34, 1  ;;  %v171_v40 = vsel %vm170_vm4, %v115_v31, %v169_v37  ;;  %595 = vmatprep.subr.mxu1 %v631_v5 }
  0x25   :  { %v138_v39 = vrot.slane %v137_v36, 1  ;;  %596 = vmatpush3.msra.mxu1 %v232_v47 }
  0x26   :  { %v127_v41 = vadd.f32 %v126_v38, %v125_v34  ;;  %597 = vmatprep.subr.mxu1 %v631_v5 }
  0x27   :  { %v139_v42 = vadd.f32 %v138_v39, %v137_v36  ;;  %598 = vmatpush3.msra.mxu1 %v231_v48 }
  0x28   :  { %v173_v43 = vsel %vm172_vm5, %v127_v41, %v171_v40  ;;  %599 = vmatprep.subr.mxu1 %v631_v5 }
  0x29   :  { %v175_v44 = vsel %vm174_vm6, %v139_v42, %v173_v43  ;;  %600 = vmatpush3.msra.mxu1 %v230_v49 }
  0x2a   :  { %v194_v45 = vmul.f32 0.125, %v175_v44  ;;  %601 = vmatprep.subr.mxu1 %v631_v5 }
  0x2b   :  { %602 = vmatpush3.msra.mxu1 %v229_v50 }
  0x2c   :  { %326 = vmatmul.mubr.f32.vlgmr.msra.gmra.mxu0 %v194_v45 }
  0x2d   :  { %622 = vmatprep.mubr.msk.f32.mxu0 %vm632_vm7, %v631_v5  ;;  %607 = vmatpush3.msra.mxu0 %v253_v51 }
  0x2e   :  { %608 = vmatprep.subr.mxu0 %v631_v5 }
  0x2f   :  { %609 = vmatpush3.msra.mxu0 %v252_v52 }
  0x30   :  { %610 = vmatprep.subr.mxu0 %v631_v5 }
  0x31   :  { %611 = vmatpush3.msra.mxu0 %v251_v53 }
  0x32   :  { %612 = vmatprep.subr.mxu0 %v631_v5 }
  0x33   :  { %613 = vmatpush3.msra.mxu0 %v250_v54 }
  0x34   :  { %614 = vmatprep.subr.mxu0 %v631_v5 }
  0x35   :  { %615 = vmatpush3.msra.mxu0 %v249_v55 }
  0x36   :  { %616 = vmatprep.subr.mxu0 %v631_v5 }
  0x37   :  { %617 = vmatpush3.msra.mxu0 %v248_v62 }
  0x38   :  { %618 = vmatprep.subr.mxu0 %v631_v5 }
  0x39   :  { %619 = vmatpush3.msra.mxu0 %v247_v63 }
  0x3a   :  { %620 = vmatprep.subr.mxu0 %v631_v5  ;;  %v508_v5 = vld [vmem:[%s947_s6] ss:$0 sm:$0xff] }
  0x3b   :  { %621 = vmatpush3.msra.mxu0 %v246_v0 }
  0xec   :  { %v542_v56 = vpop.f32.mrf.mxu0 }
  0xee   :  { %v543_v58 = vpop.f32.mrf.mxu0 }
  0xef   :  { %v544_v59 = vadd.f32 %v543_v58, %v542_v56 }
  0xf1   :  { %v328_v60 = vadd.f32 %v544_v59, %v506_v57 }
  0xf3   :  { %v331_v61 = vmax.f32 %v328_v60, 0.0 }
  0xf5   :  { %604 = vmatmul.mubr.f32.vlgmr.msra.gmra.mxu1 %v331_v61 }
 0x1b5   :  { %v404_v2 = vpop.f32.mrf.mxu1 }
 0x1b6   :  { %v405_v3 = vadd.f32 %v507_v1, %v404_v2 }
 0x1b7   :  { %v605_v4 = vpop.f32.mrf.mxu1 }
 0x1b8   :  { %v408_v6 = vmax.f32 %v405_v3, 0.0 }
 0x1ba   :  { %623 = vmatmul.mubr.msk.f32.vlgmr.msra.gmra.mxu0 %vm415_vm8, %v408_v6 }
 0x27a   :  { %v485_v9 = vpop.f32.mrf.mxu0 }
 0x27b   :  { %v486_v10 = vadd.f32 %v508_v5, %v485_v9 }
 0x27c   :  { %v624_v11 = vpop.f32.mrf.mxu0 }
 0x27d   :  { %v492_v12 = vsel %vm491_vm9, 0.0, %v486_v10  ;;  %v498_v17 = vmax.f32 %v486_v10, 0.0 }
 0x27e   :  { %v493_v13 = vsub.f32 0.0, %v492_v12 }
 0x280   :  { %v494_v14 = vmul.f32 1.442695, %v493_v13 }
 0x282   :  { %627 = vpow2.f32 %v494_v14 }
 0x28f   :  { %v628_v15 = vpop.eup %627 }
 0x290   :  { %v496_v16 = vadd.f32 1.0, %v628_v15 }
 0x292   :  { %629 = vrcp.f32 %v496_v16 }
 0x29f   :  { %v630_v18 = vpop.eup %629 }
 0x2a0   :  { %v499_v19 = vsel %vm491_vm9, %v498_v17, %v630_v18 }
 0x2a1   :  { %501 = vst.msk [vmem:[%s948_s7] sm:$0xff] %vm500_vm10, %v499_v19 }

</bundles_post_ra>
